<compile_context>
chip_gen: v5e
topology: v5e:2x2
jax: 0.10.0
libtpu: 0.0.40
codegen_flags: <defaults>
</compile_context>

<pallas_src>
import numpy as np
import jax
import jax.numpy as jnp
from jax.experimental import pallas as pl
from jax.experimental.pallas import tpu as pltpu

NEG_BIG = -1e30       # softmax-neutral logit for padded label lanes


def actor_kernel(w_ref, p_ref, w_word_ref, emb_proj_ref, b_in_ref,
                 w_cls_ref, b_cls_ref, logits_ref, probs_ref):
    S = p_ref.shape[1]
    NP = emb_proj_ref.shape[0]

    # Word branch: token mean folded into the row-tiled / (1/S)-scaled weight
    # -> one lane-dense K = S*G MXU contraction, no reduction.
    h = jnp.dot(w_ref[...], w_word_ref[...],
                preferred_element_type=jnp.float32)                     # (TB, H)

    # POS branch: embedding lookup expressed as per-row tag counts (exact
    # small integers) times the pre-projected (NP, H) table. S is tiny and
    # static; per-token one-hot compares are lane broadcasts of (TB,1) slices,
    # pairwise tree-summed to keep the add chain / live vregs short.
    pos_ids = jax.lax.broadcasted_iota(jnp.int32, (1, NP), 1)           # (1, NP)
    parts = [(p_ref[:, s:s + 1] == pos_ids).astype(jnp.float32) for s in range(S)]
    while len(parts) > 1:
        nxt = [parts[k] + parts[k + 1] for k in range(0, len(parts) - 1, 2)]
        if len(parts) % 2:
            nxt.append(parts[-1])
        parts = nxt
    counts = parts[0]                                                   # (TB, NP)
    h = h + jnp.dot(counts.astype(emb_proj_ref.dtype), emb_proj_ref[...],
                    preferred_element_type=jnp.float32)

    h = h + b_in_ref[...]
    # TODO(synk): dropout (p=0.5) is treated as inference-mode identity.
    h = jnp.maximum(h, 0.0)

    # Classifier over the lane-padded label dim. Padded weight columns are 0
    # and padded bias is -1e30 -> exp underflows to 0, softmax over the real
    # labels stays exact.
    logits = jnp.dot(h.astype(w_cls_ref.dtype), w_cls_ref[...],
                     preferred_element_type=jnp.float32) + b_cls_ref[...]  # (TB, LP)
    m = jnp.max(logits, axis=-1, keepdims=True)
    e = jnp.exp(logits - m)
    denom = jnp.sum(e, axis=-1, keepdims=True)
    inv = pl.reciprocal(denom, approx=True)      # EUP slot (has slack)
    inv = inv * (2.0 - denom * inv)              # one Newton step -> ~f32 exact
    probs = e * inv

    logits_ref[...] = logits
    probs_ref[...] = probs


def _round_up(x, m):
    return -(-x // m) * m


def _choose_tile(B, tb_req=512):
    """Pick batch tile & padded batch: sublane-aligned, big enough to hide the
    per-grid-step overhead, and with >= 2 grid steps when there is enough work
    so both v7x TensorCores get a share."""
    B8 = _round_up(max(B, 1), 8)
    tb = min(_round_up(tb_req, 8), B8)
    n = -(-B8 // tb)
    if B8 > 8 and n < 2:
        n = 2
    tb = _round_up(-(-B8 // n), 8)
    return tb, n * tb


def actor_forward(w, p, params, *, tb=512, use_bf16=False):
    """w: (B, S, G) float32 word vectors, p: (B, S) int32 POS indices."""
    B, S, G = w.shape
    NP, P = params["pos_embed"].shape
    H = params["W_word"].shape[1]
    L = params["b_cls"].shape[-1]
    LP = 64 if L <= 64 else _round_up(L, 128)

    wt_dtype = jnp.bfloat16 if use_bf16 else jnp.float32
    itemsize = jnp.dtype(wt_dtype).itemsize

    # --- one-time parameter prep (plain JAX, outside the hot loop) ---------
    inv_s = 1.0 / S
    # Word weight: row-tiled S times and pre-scaled by 1/S so the token mean
    # folds into a single lane-dense contraction.
    W_word_t = (jnp.tile(params["W_word"], (S, 1)) * inv_s).astype(wt_dtype)   # (S*G, H)
    # POS table pre-projected through W_pos (and 1/S): (NP, H), ~KBs.
    emb_proj = (params["pos_embed"] @ params["W_pos"] * inv_s).astype(wt_dtype)
    b_in = (params["b_word"] + params["b_pos"]).astype(jnp.float32)            # (1, H)
    W_cls = jnp.pad(params["W_cls"], ((0, 0), (0, LP - L))).astype(wt_dtype)   # (H, LP)
    b_cls = jnp.pad(params["b_cls"], ((0, 0), (0, LP - L)),
                    constant_values=NEG_BIG).astype(jnp.float32)               # (1, LP)

    # Lane-dense activations: (B, S*G) so every vreg row is 128-lane full.
    SG = S * G
    w_flat = w.reshape(B, SG).astype(wt_dtype)
    p = p.astype(jnp.int32)

    # --- pad batch and tile it over a parallel 1-D grid ---------------------
    tb, B_pad = _choose_tile(B, tb)
    if B_pad != B:
        w_flat = jnp.pad(w_flat, ((0, B_pad - B), (0, 0)))
        p = jnp.pad(p, ((0, B_pad - B), (0, 0)))

    cost = pl.CostEstimate(
        flops=2 * B_pad * (SG * H + NP * H + H * LP),
        transcendentals=B_pad * (LP + 1),
        bytes_accessed=(B_pad * SG * itemsize + B_pad * S * 4
                        + B_pad * 2 * LP * 4
                        + (W_word_t.size + emb_proj.size + W_cls.size) * itemsize
                        + (b_in.size + b_cls.size) * 4),
    )

    # Raise the scoped-VMEM limit only if a very large tile was requested
    # (v5e default is 16 MiB); at the default tb=512 the double-buffered
    # footprint is ~1.6 MiB and needs nothing special.
    est_vmem = (2 * tb * (SG * itemsize + S * 4 + 2 * LP * 4)
                + 2 * ((W_word_t.size + emb_proj.size + W_cls.size) * itemsize
                       + (b_in.size + b_cls.size) * 4))
    cp_kwargs = dict(dimension_semantics=("parallel",))
    if est_vmem > 12 * 1024 * 1024:
        cp_kwargs["vmem_limit_bytes"] = min(int(est_vmem * 2), 100 * 1024 * 1024)

    logits_p, probs_p = pl.pallas_call(
        actor_kernel,
        out_shape=(jax.ShapeDtypeStruct((B_pad, LP), jnp.float32),
                   jax.ShapeDtypeStruct((B_pad, LP), jnp.float32)),
        grid_spec=pltpu.PrefetchScalarGridSpec(
            num_scalar_prefetch=0,
            grid=(B_pad // tb,),
            in_specs=[
                pl.BlockSpec((tb, SG), lambda i: (i, 0)),          # w (lane-dense)
                pl.BlockSpec((tb, S), lambda i: (i, 0)),           # p (int32)
                pl.BlockSpec(W_word_t.shape, lambda i: (0, 0)),    # tiled word W
                pl.BlockSpec(emb_proj.shape, lambda i: (0, 0)),    # pre-projected POS table
                pl.BlockSpec(b_in.shape, lambda i: (0, 0)),        # fused bias
                pl.BlockSpec(W_cls.shape, lambda i: (0, 0)),       # classifier W (padded)
                pl.BlockSpec(b_cls.shape, lambda i: (0, 0)),       # classifier b (padded)
            ],
            out_specs=[pl.BlockSpec((tb, LP), lambda i: (i, 0)),
                       pl.BlockSpec((tb, LP), lambda i: (i, 0))],
        ),
        compiler_params=pltpu.CompilerParams(**cp_kwargs),
        cost_estimate=cost,
    )(w_flat, p, W_word_t, emb_proj, b_in, W_cls, b_cls)

    logits = logits_p[:B, :L]
    probs = probs_p[:B, :L]
    return probs, logits


def make_params(key, glove_dim, pos_dim, hidden, n_pos, n_labels):
    ks = jax.random.split(key, 8)

    def linear(kw, kb, fan_in, fan_out):
        bound = 1.0 / np.sqrt(fan_in)
        W = jax.random.uniform(kw, (fan_in, fan_out), jnp.float32, -bound, bound)
        b = jax.random.uniform(kb, (1, fan_out), jnp.float32, -bound, bound)
        return W, b

    W_word, b_word = linear(ks[0], ks[1], glove_dim, hidden)
    W_pos, b_pos = linear(ks[2], ks[3], pos_dim, hidden)
    W_cls, b_cls = linear(ks[4], ks[5], hidden, n_labels)

    # Embedding table (num_embeddings, posDim); max_norm=1 emulated by
    # pre-renormalizing rows whose L2 norm exceeds 1 (forward-equivalent for
    # a fixed deterministic table).
    emb = jax.random.normal(ks[6], (n_pos, pos_dim), jnp.float32)
    norms = jnp.linalg.norm(emb, axis=-1, keepdims=True)
    emb = emb * jnp.minimum(1.0, 1.0 / jnp.maximum(norms, 1e-12))

    return {"W_word": W_word, "b_word": b_word,
            "W_pos": W_pos, "b_pos": b_pos,
            "W_cls": W_cls, "b_cls": b_cls,
            "pos_embed": emb}


def reference_forward(w, p, params):
    """Faithful plain-JAX replica of Actor.forward (mean, includeDep=False)."""
    p_embed = jnp.take(params["pos_embed"], p, axis=0)   # Embedding lookup
    w_mean = jnp.mean(w, axis=-2)
    p_mean = jnp.mean(p_embed, axis=-2)
    h = w_mean @ params["W_word"] + params["b_word"]
    h = h + p_mean @ params["W_pos"] + params["b_pos"]
    h = jnp.maximum(h, 0.0)                               # dropout = identity
    logits = h @ params["W_cls"] + params["b_cls"]
    probs = jax.nn.softmax(logits, axis=-1)
    return probs, logits


if __name__ == "__main__":
    # Small shapes consistent with the module: context=4 -> seq = 2*context = 8
    B, CONTEXT = 2, 4
    S = 2 * CONTEXT
    GLOVE_DIM, POS_DIM, HIDDEN = 32, 16, 32
    N_POS, N_LABELS = 12, 8

    key = jax.random.PRNGKey(0)
    k_params, k_w, k_p = jax.random.split(key, 3)

    params = make_params(k_params, GLOVE_DIM, POS_DIM, HIDDEN, N_POS, N_LABELS)

    w = jax.random.normal(k_w, (B, S, GLOVE_DIM), jnp.float32)
    p = jax.random.randint(k_p, (B, S), 0, N_POS, jnp.int32)

    probs, logits = actor_forward(w, p, params)
    probs = jax.block_until_ready(probs)
    logits = jax.block_until_ready(logits)

    ref_probs, ref_logits = reference_forward(w, p, params)
    assert np.allclose(np.asarray(logits), np.asarray(ref_logits), atol=1e-4)
    assert np.allclose(np.asarray(probs), np.asarray(ref_probs), atol=1e-4)
    assert np.allclose(np.asarray(probs).sum(-1), 1.0, atol=1e-4)

    # Second check exercising a multi-step ("parallel") grid with batch padding.
    k_w2, k_p2 = jax.random.split(jax.random.PRNGKey(1), 2)
    B2 = 20
    w2 = jax.random.normal(k_w2, (B2, S, GLOVE_DIM), jnp.float32)
    p2 = jax.random.randint(k_p2, (B2, S), 0, N_POS, jnp.int32)
    probs2, logits2 = actor_forward(w2, p2, params)
    probs2 = jax.block_until_ready(probs2)
    logits2 = jax.block_until_ready(logits2)
    ref_probs2, ref_logits2 = reference_forward(w2, p2, params)
    assert np.allclose(np.asarray(logits2), np.asarray(ref_logits2), atol=1e-4)
    assert np.allclose(np.asarray(probs2), np.asarray(ref_probs2), atol=1e-4)

    print("KERNEL_OK")
</pallas_src>

<mosaic_0001>
module attributes {stable_mosaic.version = 11 : i64} {
  func.func @actor_kernel(%arg0: i32, %arg1: memref<8x256xf32, #tpu.memory_space<vmem>>, %arg2: memref<8x8xi32, #tpu.memory_space<vmem>>, %arg3: memref<256x32xf32, #tpu.memory_space<vmem>>, %arg4: memref<12x32xf32, #tpu.memory_space<vmem>>, %arg5: memref<1x32xf32, #tpu.memory_space<vmem>>, %arg6: memref<32x64xf32, #tpu.memory_space<vmem>>, %arg7: memref<1x64xf32, #tpu.memory_space<vmem>>, %arg8: memref<8x64xf32, #tpu.memory_space<vmem>>, %arg9: memref<8x64xf32, #tpu.memory_space<vmem>>) attributes {dimension_semantics = [#tpu.dimension_semantics<parallel>], iteration_bounds = array<i64: 1>, scalar_prefetch = 0 : i64, scratch_operands = 0 : i64, tpu.core_type = #tpu.core_type<tc>, window_params = [{transform_indices = @transform_0, window_bounds = array<i64: 8, 256>}, {transform_indices = @transform_1, window_bounds = array<i64: 8, 8>}, {pipeline_mode = #tpu.pipeline_mode<synchronous>, transform_indices = @transform_2, window_bounds = array<i64: 256, 32>}, {pipeline_mode = #tpu.pipeline_mode<synchronous>, transform_indices = @transform_3, window_bounds = array<i64: 12, 32>}, {pipeline_mode = #tpu.pipeline_mode<synchronous>, transform_indices = @transform_4, window_bounds = array<i64: 1, 32>}, {pipeline_mode = #tpu.pipeline_mode<synchronous>, transform_indices = @transform_5, window_bounds = array<i64: 32, 64>}, {pipeline_mode = #tpu.pipeline_mode<synchronous>, transform_indices = @transform_6, window_bounds = array<i64: 1, 64>}, {transform_indices = @transform_7, window_bounds = array<i64: 8, 64>}, {transform_indices = @transform_8, window_bounds = array<i64: 8, 64>}]} {
    %c0 = arith.constant 0 : index
    %c0_0 = arith.constant 0 : index
    %0 = vector.load %arg1[%c0, %c0_0] : memref<8x256xf32, #tpu.memory_space<vmem>>, vector<8x256xf32>
    %c0_1 = arith.constant 0 : index
    %c0_2 = arith.constant 0 : index
    %1 = vector.load %arg3[%c0_1, %c0_2] : memref<256x32xf32, #tpu.memory_space<vmem>>, vector<256x32xf32>
    %cst = arith.constant dense<0.000000e+00> : vector<8x32xf32>
    %2 = tpu.matmul %0, %1, %cst {dimension_numbers = #tpu.dot_dimension_numbers<[1], [0], [0], [1], [0, 0, 1, 1], [], []>} : vector<8x256xf32>, vector<256x32xf32>, vector<8x32xf32> -> vector<8x32xf32>
    %3 = tpu.iota {dimensions = array<i32: 1>} : vector<1x12xi32>
    %c0_3 = arith.constant 0 : index
    %c0_4 = arith.constant 0 : index
    %4 = vector.load %arg2[%c0_3, %c0_4] : memref<8x8xi32, #tpu.memory_space<vmem>>, vector<8x1xi32>
    %5 = vector.broadcast %4 : vector<8x1xi32> to vector<8x12xi32>
    %6 = vector.broadcast %3 : vector<1x12xi32> to vector<8x12xi32>
    %7 = arith.cmpi eq, %5, %6 : vector<8x12xi32>
    %8 = arith.extui %7 : vector<8x12xi1> to vector<8x12xi32>
    %9 = arith.sitofp %8 : vector<8x12xi32> to vector<8x12xf32>
    %c0_5 = arith.constant 0 : index
    %c1 = arith.constant 1 : index
    %10 = vector.load %arg2[%c0_5, %c1] : memref<8x8xi32, #tpu.memory_space<vmem>>, vector<8x1xi32>
    %11 = vector.broadcast %10 : vector<8x1xi32> to vector<8x12xi32>
    %12 = vector.broadcast %3 : vector<1x12xi32> to vector<8x12xi32>
    %13 = arith.cmpi eq, %11, %12 : vector<8x12xi32>
    %14 = arith.extui %13 : vector<8x12xi1> to vector<8x12xi32>
    %15 = arith.sitofp %14 : vector<8x12xi32> to vector<8x12xf32>
    %c0_6 = arith.constant 0 : index
    %c2 = arith.constant 2 : index
    %16 = vector.load %arg2[%c0_6, %c2] : memref<8x8xi32, #tpu.memory_space<vmem>>, vector<8x1xi32>
    %17 = vector.broadcast %16 : vector<8x1xi32> to vector<8x12xi32>
    %18 = vector.broadcast %3 : vector<1x12xi32> to vector<8x12xi32>
    %19 = arith.cmpi eq, %17, %18 : vector<8x12xi32>
    %20 = arith.extui %19 : vector<8x12xi1> to vector<8x12xi32>
    %21 = arith.sitofp %20 : vector<8x12xi32> to vector<8x12xf32>
    %c0_7 = arith.constant 0 : index
    %c3 = arith.constant 3 : index
    %22 = vector.load %arg2[%c0_7, %c3] : memref<8x8xi32, #tpu.memory_space<vmem>>, vector<8x1xi32>
    %23 = vector.broadcast %22 : vector<8x1xi32> to vector<8x12xi32>
    %24 = vector.broadcast %3 : vector<1x12xi32> to vector<8x12xi32>
    %25 = arith.cmpi eq, %23, %24 : vector<8x12xi32>
    %26 = arith.extui %25 : vector<8x12xi1> to vector<8x12xi32>
    %27 = arith.sitofp %26 : vector<8x12xi32> to vector<8x12xf32>
    %c0_8 = arith.constant 0 : index
    %c4 = arith.constant 4 : index
    %28 = vector.load %arg2[%c0_8, %c4] : memref<8x8xi32, #tpu.memory_space<vmem>>, vector<8x1xi32>
    %29 = vector.broadcast %28 : vector<8x1xi32> to vector<8x12xi32>
    %30 = vector.broadcast %3 : vector<1x12xi32> to vector<8x12xi32>
    %31 = arith.cmpi eq, %29, %30 : vector<8x12xi32>
    %32 = arith.extui %31 : vector<8x12xi1> to vector<8x12xi32>
    %33 = arith.sitofp %32 : vector<8x12xi32> to vector<8x12xf32>
    %c0_9 = arith.constant 0 : index
    %c5 = arith.constant 5 : index
    %34 = vector.load %arg2[%c0_9, %c5] : memref<8x8xi32, #tpu.memory_space<vmem>>, vector<8x1xi32>
    %35 = vector.broadcast %34 : vector<8x1xi32> to vector<8x12xi32>
    %36 = vector.broadcast %3 : vector<1x12xi32> to vector<8x12xi32>
    %37 = arith.cmpi eq, %35, %36 : vector<8x12xi32>
    %38 = arith.extui %37 : vector<8x12xi1> to vector<8x12xi32>
    %39 = arith.sitofp %38 : vector<8x12xi32> to vector<8x12xf32>
    %c0_10 = arith.constant 0 : index
    %c6 = arith.constant 6 : index
    %40 = vector.load %arg2[%c0_10, %c6] : memref<8x8xi32, #tpu.memory_space<vmem>>, vector<8x1xi32>
    %41 = vector.broadcast %40 : vector<8x1xi32> to vector<8x12xi32>
    %42 = vector.broadcast %3 : vector<1x12xi32> to vector<8x12xi32>
    %43 = arith.cmpi eq, %41, %42 : vector<8x12xi32>
    %44 = arith.extui %43 : vector<8x12xi1> to vector<8x12xi32>
    %45 = arith.sitofp %44 : vector<8x12xi32> to vector<8x12xf32>
    %c0_11 = arith.constant 0 : index
    %c7 = arith.constant 7 : index
    %46 = vector.load %arg2[%c0_11, %c7] : memref<8x8xi32, #tpu.memory_space<vmem>>, vector<8x1xi32>
    %47 = vector.broadcast %46 : vector<8x1xi32> to vector<8x12xi32>
    %48 = vector.broadcast %3 : vector<1x12xi32> to vector<8x12xi32>
    %49 = arith.cmpi eq, %47, %48 : vector<8x12xi32>
    %50 = arith.extui %49 : vector<8x12xi1> to vector<8x12xi32>
    %51 = arith.sitofp %50 : vector<8x12xi32> to vector<8x12xf32>
    %52 = arith.addf %9, %15 : vector<8x12xf32>
    %53 = arith.addf %21, %27 : vector<8x12xf32>
    %54 = arith.addf %33, %39 : vector<8x12xf32>
    %55 = arith.addf %45, %51 : vector<8x12xf32>
    %56 = arith.addf %52, %53 : vector<8x12xf32>
    %57 = arith.addf %54, %55 : vector<8x12xf32>
    %58 = arith.addf %56, %57 : vector<8x12xf32>
    %c0_12 = arith.constant 0 : index
    %c0_13 = arith.constant 0 : index
    %59 = vector.load %arg4[%c0_12, %c0_13] : memref<12x32xf32, #tpu.memory_space<vmem>>, vector<12x32xf32>
    %cst_14 = arith.constant dense<0.000000e+00> : vector<8x32xf32>
    %60 = tpu.matmul %58, %59, %cst_14 {dimension_numbers = #tpu.dot_dimension_numbers<[1], [0], [0], [1], [0, 0, 1, 1], [], []>} : vector<8x12xf32>, vector<12x32xf32>, vector<8x32xf32> -> vector<8x32xf32>
    %61 = arith.addf %2, %60 : vector<8x32xf32>
    %c0_15 = arith.constant 0 : index
    %c0_16 = arith.constant 0 : index
    %62 = vector.load %arg5[%c0_15, %c0_16] : memref<1x32xf32, #tpu.memory_space<vmem>>, vector<1x32xf32>
    %63 = vector.broadcast %62 : vector<1x32xf32> to vector<8x32xf32>
    %64 = arith.addf %61, %63 : vector<8x32xf32>
    %cst_17 = arith.constant 0.000000e+00 : f32
    %65 = vector.broadcast %cst_17 : f32 to vector<8x32xf32>
    %66 = arith.maximumf %64, %65 : vector<8x32xf32>
    %c0_18 = arith.constant 0 : index
    %c0_19 = arith.constant 0 : index
    %67 = vector.load %arg6[%c0_18, %c0_19] : memref<32x64xf32, #tpu.memory_space<vmem>>, vector<32x64xf32>
    %cst_20 = arith.constant dense<0.000000e+00> : vector<8x64xf32>
    %68 = tpu.matmul %66, %67, %cst_20 {dimension_numbers = #tpu.dot_dimension_numbers<[1], [0], [0], [1], [0, 0, 1, 1], [], []>} : vector<8x32xf32>, vector<32x64xf32>, vector<8x64xf32> -> vector<8x64xf32>
    %c0_21 = arith.constant 0 : index
    %c0_22 = arith.constant 0 : index
    %69 = vector.load %arg7[%c0_21, %c0_22] : memref<1x64xf32, #tpu.memory_space<vmem>>, vector<1x64xf32>
    %70 = vector.broadcast %69 : vector<1x64xf32> to vector<8x64xf32>
    %71 = arith.addf %68, %70 : vector<8x64xf32>
    %cst_23 = arith.constant dense<0xFF800000> : vector<8xf32>
    %72 = vector.multi_reduction <maximumf>, %71, %cst_23 [1] : vector<8x64xf32> to vector<8xf32>
    %73 = vector.shape_cast %72 : vector<8xf32> to vector<8x1xf32>
    %74 = vector.broadcast %73 : vector<8x1xf32> to vector<8x64xf32>
    %75 = arith.subf %71, %74 : vector<8x64xf32>
    %76 = math.exp %75 : vector<8x64xf32>
    %cst_24 = arith.constant dense<0.000000e+00> : vector<8xf32>
    %77 = vector.multi_reduction <add>, %76, %cst_24 [1] : vector<8x64xf32> to vector<8xf32>
    %78 = vector.shape_cast %77 : vector<8xf32> to vector<8x1xf32>
    %79 = tpu.reciprocal %78 {approx = true} : vector<8x1xf32> -> vector<8x1xf32>
    %80 = arith.mulf %78, %79 : vector<8x1xf32>
    %cst_25 = arith.constant 2.000000e+00 : f32
    %81 = vector.broadcast %cst_25 : f32 to vector<8x1xf32>
    %82 = arith.subf %81, %80 : vector<8x1xf32>
    %83 = arith.mulf %79, %82 : vector<8x1xf32>
    %84 = vector.broadcast %83 : vector<8x1xf32> to vector<8x64xf32>
    %85 = arith.mulf %76, %84 : vector<8x64xf32>
    %c0_26 = arith.constant 0 : index
    %c0_27 = arith.constant 0 : index
    %86 = vector.load %arg8[%c0_26, %c0_27] : memref<8x64xf32, #tpu.memory_space<vmem>>, vector<8x64xf32>
    tpu.vector_store %arg8[%c0_26, %c0_27], %71 {strides = array<i32>} : memref<8x64xf32, #tpu.memory_space<vmem>>, vector<8x64xf32>,
    %c0_28 = arith.constant 0 : index
    %c0_29 = arith.constant 0 : index
    %87 = vector.load %arg9[%c0_28, %c0_29] : memref<8x64xf32, #tpu.memory_space<vmem>>, vector<8x64xf32>
    tpu.vector_store %arg9[%c0_28, %c0_29], %85 {strides = array<i32>} : memref<8x64xf32, #tpu.memory_space<vmem>>, vector<8x64xf32>,
    return
  }
  func.func @transform_0(%arg0: i32) -> (i32, i32) {
    %c0_i32 = arith.constant 0 : i32
    %c0_i32_0 = arith.constant 0 : i32
    return %arg0, %c0_i32 : i32, i32
  }
  func.func @transform_1(%arg0: i32) -> (i32, i32) {
    %c0_i32 = arith.constant 0 : i32
    %c0_i32_0 = arith.constant 0 : i32
    return %arg0, %c0_i32 : i32, i32
  }
  func.func @transform_2(%arg0: i32) -> (i32, i32) {
    %c0_i32 = arith.constant 0 : i32
    %c0_i32_0 = arith.constant 0 : i32
    %c0_i32_1 = arith.constant 0 : i32
    return %c0_i32, %c0_i32_0 : i32, i32
  }
  func.func @transform_3(%arg0: i32) -> (i32, i32) {
    %c0_i32 = arith.constant 0 : i32
    %c0_i32_0 = arith.constant 0 : i32
    %c0_i32_1 = arith.constant 0 : i32
    return %c0_i32, %c0_i32_0 : i32, i32
  }
  func.func @transform_4(%arg0: i32) -> (i32, i32) {
    %c0_i32 = arith.constant 0 : i32
    %c0_i32_0 = arith.constant 0 : i32
    %c0_i32_1 = arith.constant 0 : i32
    return %c0_i32, %c0_i32_0 : i32, i32
  }
  func.func @transform_5(%arg0: i32) -> (i32, i32) {
    %c0_i32 = arith.constant 0 : i32
    %c0_i32_0 = arith.constant 0 : i32
    %c0_i32_1 = arith.constant 0 : i32
    return %c0_i32, %c0_i32_0 : i32, i32
  }
  func.func @transform_6(%arg0: i32) -> (i32, i32) {
    %c0_i32 = arith.constant 0 : i32
    %c0_i32_0 = arith.constant 0 : i32
    %c0_i32_1 = arith.constant 0 : i32
    return %c0_i32, %c0_i32_0 : i32, i32
  }
  func.func @transform_7(%arg0: i32) -> (i32, i32) {
    %c0_i32 = arith.constant 0 : i32
    %c0_i32_0 = arith.constant 0 : i32
    return %arg0, %c0_i32 : i32, i32
  }
  func.func @transform_8(%arg0: i32) -> (i32, i32) {
    %c0_i32 = arith.constant 0 : i32
    %c0_i32_0 = arith.constant 0 : i32
    return %arg0, %c0_i32 : i32, i32
  }
}

</mosaic_0001>

<bundles_post_ra>
// kernel: tpu_custom_call.1
= control target key start
LH: loop header
LB: loop body
LE: loop exit
PB: predicated region body
PF: predicated region fallthrough
CT: control target
= control target key end

     0   :  { %14 = vsyncpa [#allocation3], 0  ;;  %v368_v1 = vmov 2   ;;  %v369_v2 = vmov 0   ;;  %s563_s0 = inlined_call_operand.vmem [shape: f32[8,256], index: 0, kind: input, shape index: {}]   ;;  %s564_s1 = inlined_call_operand.vmem [shape: s32[8,8], index: 1, kind: input, shape index: {}]   ;;  %s565_s2 = inlined_call_operand.vmem [shape: f32[256,32], index: 2, kind: input, shape index: {}]   ;;  %s566_s3 = inlined_call_operand.vmem [shape: f32[12,32], index: 3, kind: input, shape index: {}]   ;;  %s567_s4 = inlined_call_operand.vmem [shape: f32[1,32], index: 4, kind: input, shape index: {}]   ;;  %s568_s5 = inlined_call_operand.vmem [shape: f32[32,64], index: 5, kind: input, shape index: {}]   ;;  %s569_s6 = inlined_call_operand.vmem [shape: f32[1,64], index: 6, kind: input, shape index: {}]   ;;  %s570_s7 = inlined_call_operand.hbm [shape: f32[8,64], index: 7, kind: output, shape index: {0}]   ;;  %s571_s8 = inlined_call_operand.hbm [shape: f32[8,64], index: 8, kind: output, shape index: {1}]  }
   0x1   :  { %v66_v0 = vld [vmem:[%s564_s1] sm:$0xff]  ;;  %303 = vset.pattern.permute.xlu1 %v368_v1  ;;  %301 = vset.pattern.permute.xlu0 %v369_v2 }
   0x2   :  { %80 = vperm.xlu1 %303, %v66_v0   ;;  %68 = vperm.xlu0 %301, %v66_v0  }
   0x3   :  { %15 = vsyncpa [#allocation5], 0  ;;  %v370_v3 = vmov 4   ;;  %v371_v4 = vmov 3   ;;  %v372_v5 = vmov 1   ;;  %v373_v6 = vmov 5  }
   0x4   :  { %305 = vset.pattern.permute.xlu2 %v370_v3  ;;  %v374_v7 = vmov 6   ;;  %v375_v8 = vmov 7   ;;  %v63_v9 = vld [vmem:[%s565_s2 + $0xf8] sm:$0xff]  ;;  %v62_v10 = vld [vmem:[%s565_s2 + $0xf0] sm:$0xff]  ;;  %v61_v13 = vld [vmem:[%s565_s2 + $0xe8] sm:$0xff]  ;;  %vm128_vm0 = vcmask 1043456   ;;  %v64_v49 = vlaneseq }
   0x5   :  { %92 = vperm.xlu2 %305, %v66_v0   ;;  %v47_v11 = vld [vmem:[%s565_s2 + $0x78] sm:$0xff]  ;;  %172 = vmatpush.msra.mxu2 %v63_v9  ;;  %v46_v12 = vld [vmem:[%s565_s2 + $0x70] sm:$0xff]  ;;  %v60_v14 = vld [vmem:[%s565_s2 + $0xe0] sm:$0xff]  ;;  %v376_v54 = vmov 0.0   ;;  %vm124_vm9 = vcmask 97280   ;;  %vm206_vm10 = vcmask 261120  }
   0x6   :  { %152 = vmatpush.msra.mxu1 %v47_v11  ;;  %v45_v15 = vld [vmem:[%s565_s2 + $0x68] sm:$0xff]  ;;  %v59_v16 = vld [vmem:[%s565_s2 + $0xd8] sm:$0xff]  ;;  %v44_v17 = vld [vmem:[%s565_s2 + $0x60] sm:$0xff]  ;;  %v65_v52 = vand.u32 127, %v64_v49  ;;  %vm230_vm11 = vcmask 523264   ;;  %s254_s19 = sshll.u32 %s570_s7, 4  ;;  %s255_s19 = int_to_ptr.hbm [resolvable:$true] %s254_s19 }
   0x7   :  { %173 = vmatpush.msra.mxu2 %v62_v10  ;;  %v58_v18 = vld [vmem:[%s565_s2 + $0xd0] sm:$0xff]  ;;  %v43_v19 = vld [vmem:[%s565_s2 + $0x58] sm:$0xff]  ;;  %v57_v20 = vld [vmem:[%s565_s2 + $0xc8] sm:$0xff]  ;;  %s378_s20 = smov [#allocation4]   ;;  %s265_s24 = sshll.u32 %s571_s8, 4  ;;  %s266_s24 = int_to_ptr.hbm [resolvable:$true] %s265_s24 }
   0x8   :  { %153 = vmatpush.msra.mxu1 %v46_v12  ;;  %v42_v21 = vld [vmem:[%s565_s2 + $0x50] sm:$0xff]  ;;  %v56_v22 = vld [vmem:[%s565_s2 + $0xc0] sm:$0xff]  ;;  %v41_v23 = vld [vmem:[%s565_s2 + $0x48] sm:$0xff]  ;;  %s263_s21 = sshll.u32 %s378_s20, 4  ;;  %s264_s21 = int_to_ptr.vmem [resolvable:$true] %s263_s21 }
   0x9   :  { %174 = vmatpush.msra.mxu2 %v61_v13  ;;  %v55_v24 = vld [vmem:[%s565_s2 + $0xb8] sm:$0xff]  ;;  %v40_v25 = vld [vmem:[%s565_s2 + $0x40] sm:$0xff]  ;;  %v54_v26 = vld [vmem:[%s565_s2 + $0xb0] sm:$0xff] }
   0xa   :  { %304 = vset.pattern.permute.xlu1 %v371_v4  ;;  %302 = vset.pattern.permute.xlu0 %v372_v5  ;;  %v39_v27 = vld [vmem:[%s565_s2 + $0x38] sm:$0xff]  ;;  %v53_v28 = vld [vmem:[%s565_s2 + $0xa8] sm:$0xff]  ;;  %v38_v29 = vld [vmem:[%s565_s2 + $0x30] sm:$0xff] }
   0xb   :  { %86 = vperm.xlu1 %304, %v66_v0   ;;  %74 = vperm.xlu0 %302, %v66_v0   ;;  %v52_v30 = vld [vmem:[%s565_s2 + $0xa0] sm:$0xff]  ;;  %v37_v31 = vld [vmem:[%s565_s2 + $0x28] sm:$0xff]  ;;  %v51_v32 = vld [vmem:[%s565_s2 + $0x98] sm:$0xff] }
   0xc   :  { %175 = vmatpush.msra.mxu2 %v60_v14  ;;  %154 = vmatpush.msra.mxu1 %v45_v15  ;;  %v36_v33 = vld [vmem:[%s565_s2 + $0x20] sm:$0xff]  ;;  %v50_v34 = vld [vmem:[%s565_s2 + $0x90] sm:$0xff]  ;;  %v35_v35 = vld [vmem:[%s565_s2 + $0x18] sm:$0xff] }
   0xd   :  { %306 = vset.pattern.permute.xlu2 %v373_v6  ;;  %v49_v36 = vld [vmem:[%s565_s2 + $0x88] sm:$0xff]  ;;  %v34_v37 = vld [vmem:[%s565_s2 + $0x10] sm:$0xff]  ;;  %v48_v38 = vld [vmem:[%s565_s2 + $0x80] sm:$0xff] }
   0xe   :  { %98 = vperm.xlu2 %306, %v66_v0   ;;  %176 = vmatpush.msra.mxu2 %v59_v16  ;;  %v31_v39 = vld [vmem:[%s563_s0 + $0x8] sm:$0xff]  ;;  %v122_v42 = vld [vmem:[%s566_s3] sm:$0xff] }
   0xf   :  { %155 = vmatpush.msra.mxu1 %v44_v17  ;;  %v123_v40 = vld [vmem:[%s566_s3 + $0x8] sm:$0xf]  ;;  %v32_v43 = vld [vmem:[%s565_s2] sm:$0xff] }
  0x10   :  { %177 = vmatpush.msra.mxu2 %v58_v18  ;;  %v33_v41 = vld [vmem:[%s565_s2 + $0x8] sm:$0xff]  ;;  %287 = vmatpush.msk.msra.mxu0 %vm128_vm0, %v123_v40  ;;  %v30_v45 = vld [vmem:[%s563_s0] sm:$0xff] }
  0x11   :  { %156 = vmatpush.msra.mxu1 %v43_v19  ;;  %v199_v9 = vld [vmem:[%s568_s5 + $0x8] sm:$0xff]  ;;  %v198_v10 = vld [vmem:[%s568_s5] sm:$0xff] }
  0x12   :  { %178 = vmatpush.msra.mxu2 %v57_v20  ;;  %147 = vmatpush.msra.mxu0 %v122_v42  ;;  %v310_v15 = vld [vmem:[%s567_s4] ss:$0 sm:$0xff]  ;;  %s377_s4 = smov [#allocation2]  }
  0x13   :  { %307 = vset.pattern.permute.xlu1 %v374_v7  ;;  %309 = vset.pattern.permute.xlu0 %v375_v8  ;;  %v201_v7 = vld [vmem:[%s568_s5 + $0x18] sm:$0xff]  ;;  %v311_v19 = vld [vmem:[%s569_s6] ss:$0 sm:$0xff] }
  0x14   :  { %104 = vperm.xlu1 %307, %v66_v0   ;;  %157 = vmatpush.msra.mxu1 %v42_v21 }
  0x15   :  { %179 = vmatpush.msra.mxu2 %v56_v22  ;;  %222 = vmatpush.msra.mxu3 %v201_v7 }
  0x16   :  { %308 = vset.pattern.permute.xlu2 %v375_v8  ;;  %158 = vmatpush.msra.mxu1 %v41_v23  ;;  %v200_v8 = vld [vmem:[%s568_s5 + $0x10] sm:$0xff]  ;;  %s252_s5 = sshll.u32 %s377_s4, 4  ;;  %s253_s5 = int_to_ptr.vmem [resolvable:$true] %s252_s5 }
  0x17   :  { %110 = vperm.xlu2 %308, %v66_v0   ;;  %180 = vmatpush.msra.mxu2 %v55_v24 }
  0x18   :  { %159 = vmatpush.msra.mxu1 %v40_v25  ;;  %223 = vmatpush.msra.mxu3 %v200_v8 }
  0x19   :  { %181 = vmatpush.msra.mxu2 %v54_v26 }
  0x1a   :  { %160 = vmatpush.msra.mxu1 %v39_v27  ;;  %224 = vmatpush.msra.mxu3 %v199_v9 }
  0x1b   :  { %182 = vmatpush.msra.mxu2 %v53_v28 }
  0x1c   :  { %161 = vmatpush.msra.mxu1 %v38_v29  ;;  %225 = vmatpush.msra.mxu3 %v198_v10 }
  0x1d   :  { %183 = vmatpush.msra.mxu2 %v52_v30 }
  0x1e   :  { %162 = vmatpush.msra.mxu1 %v37_v31 }
  0x1f   :  { %184 = vmatpush.msra.mxu2 %v51_v32 }
  0x20   :  { %163 = vmatpush.msra.mxu1 %v36_v33 }
  0x21   :  { %185 = vmatpush.msra.mxu2 %v50_v34 }
  0x22   :  { %164 = vmatpush.msra.mxu1 %v35_v35 }
  0x23   :  { %186 = vmatpush.msra.mxu2 %v49_v36 }
  0x24   :  { %165 = vmatpush.msra.mxu1 %v34_v37 }
  0x25   :  { %187 = vmatpush.msra.mxu2 %v48_v38 }
  0x26   :  { %188 = vmatmul.f32.vlgmr.msra.gmra.mxu2 %v31_v39  ;;  %166 = vmatpush.msra.mxu1 %v33_v41 }
  0x28   :  { %167 = vmatpush.msra.mxu1 %v32_v43 }
  0x29   :  { %168 = vmatmul.f32.vlgmr.msra.gmra.mxu1 %v30_v45 }
  0x5f   :  { %v93_v44 = vpop.permute.xlu2 %92 }
  0x60   :  { %vm94_vm4 = vcmp.eq.s32.totalorder %v93_v44, %v65_v52 }
  0x61   :  { %v283_v58 = vsel %vm94_vm4, 1.0, %v376_v54 }
  0x68   :  { %v99_v48 = vpop.permute.xlu2 %98 }
  0x69   :  { %vm100_vm5 = vcmp.eq.s32.totalorder %v99_v48, %v65_v52 }
  0x6a   :  { %v284_v59 = vsel %vm100_vm5, 1.0, %v376_v54 }
  0x6b   :  { %v117_v2 = vadd.f32 %v284_v59, %v283_v58 }
  0x71   :  { %v111_v53 = vpop.permute.xlu2 %110 }
  0x72   :  { %vm112_vm7 = vcmp.eq.s32.totalorder %v111_v53, %v65_v52 }
  0x73   :  { %v286_v61 = vsel %vm112_vm7, 1.0, %v376_v54 }
  0x74   :  { %v81_v46 = vpop.permute.xlu1 %80  ;;  %v69_v47 = vpop.permute.xlu0 %68 }
  0x75   :  { %vm70_vm1 = vcmp.eq.s32.totalorder %v69_v47, %v65_v52  ;;  %vm82_vm6 = vcmp.eq.s32.totalorder %v81_v46, %v65_v52 }
  0x76   :  { %v279_v55 = vsel %vm70_vm1, 1.0, %v376_v54  ;;  %v281_v60 = vsel %vm82_vm6, 1.0, %v376_v54 }
  0x7d   :  { %v87_v50 = vpop.permute.xlu1 %86  ;;  %v75_v51 = vpop.permute.xlu0 %74 }
  0x7e   :  { %vm88_vm2 = vcmp.eq.s32.totalorder %v87_v50, %v65_v52  ;;  %vm76_vm3 = vcmp.eq.s32.totalorder %v75_v51, %v65_v52 }
  0x7f   :  { %v282_v56 = vsel %vm88_vm2, 1.0, %v376_v54  ;;  %v280_v57 = vsel %vm76_vm3, 1.0, %v376_v54 }
  0x80   :  { %v116_v63 = vadd.f32 %v282_v56, %v281_v60  ;;  %v115_v0 = vadd.f32 %v280_v57, %v279_v55 }
  0x82   :  { %v119_v4 = vadd.f32 %v116_v63, %v115_v0 }
  0x86   :  { %v105_v62 = vpop.permute.xlu1 %104 }
  0x87   :  { %vm106_vm8 = vcmp.eq.s32.totalorder %v105_v62, %v65_v52 }
  0x88   :  { %v285_v1 = vsel %vm106_vm8, 1.0, %v376_v54 }
  0x89   :  { %v118_v3 = vadd.f32 %v286_v61, %v285_v1 }
  0x8b   :  { %v120_v5 = vadd.f32 %v118_v3, %v117_v2 }
  0x8d   :  { %v121_v6 = vadd.f32 %v120_v5, %v119_v4 }
  0x8f   :  { %288 = vmatmul.msk.f32.vlgmr.msra.gmra.mxu0 %vm124_vm9, %v121_v6 }
  0xa6   :  { %v169_v11 = vpop.f32.mrf.mxu1 }
  0xa9   :  { %v189_v13 = vpop.f32.mrf.mxu2 }
 0x10c   :  { %v149_v12 = vpop.f32.mrf.mxu0 }
 0x10d   :  { %v170_v14 = vadd.f32 %v169_v11, %v149_v12 }
 0x10f   :  { %v190_v16 = vadd.f32 %v189_v13, %v170_v14 }
 0x111   :  { %v196_v17 = vadd.f32 %v310_v15, %v190_v16 }
 0x113   :  { %v197_v18 = vmax.f32 %v196_v17, 0.0 }
 0x115   :  { %289 = vmatmul.msk.f32.vlgmr.msra.gmra.mxu3 %vm206_vm10, %v197_v18 }
 0x198   :  { %v227_v20 = vpop.f32.mrf.mxu3 }
 0x199   :  { %v228_v21 = vadd.f32 %v311_v19, %v227_v20 }
 0x19b   :  { %v231_v22 = vsel %vm230_vm11, %v228_v21, -inf  ;;  %245 = vst.msk [vmem:[#allocation2] sm:$0xff] %vm230_vm11, %v228_v21 }
 0x19c   :  { %232 = vmax.xlane.f32.xlu0 %v231_v22  ;;  %257 = dma.vmem_to_hbm [thread:$0]  %s253_s5, 128, %s255_s19, [#allocation3]  }
 0x20f   :  { %v233_v23 = vpop.xlane.xlu0 %232 }
 0x210   :  { %v234_v24 = vsub.f32 %v228_v21, %v233_v23 }
 0x212   :  { %v235_v25 = vmul.f32 1.442695, %v234_v24 }
 0x214   :  { %312 = vpow2.f32 %v235_v25 }
 0x21a   :  { %v313_v26 = vpop.eup %312 }
 0x21b   :  { %v237_v27 = vsel %vm230_vm11, %v313_v26, 0.0 }
 0x21c   :  { %238 = vadd.xlane.f32.xlu1 %v237_v27 }
 0x28f   :  { %v239_v28 = vpop.xlane.xlu1 %238 }
 0x290   :  { %314 = vrcp.f32 %v239_v28 }
 0x296   :  { %v315_v29 = vpop.eup %314 }
 0x297   :  { %v241_v30 = vmul.f32 %v315_v29, %v239_v28 }
 0x299   :  { %v242_v31 = vsub.f32 2.0, %v241_v30 }
 0x29b   :  { %v243_v32 = vmul.f32 %v315_v29, %v242_v31 }
 0x29d   :  { %v244_v33 = vmul.f32 %v313_v26, %v243_v32 }
 0x29f   :  { %246 = vst.msk [vmem:[#allocation4] sm:$0xff] %vm230_vm11, %v244_v33 }
 0x2a0   :  { %268 = dma.vmem_to_hbm [thread:$0]  %s264_s21, 128, %s266_s24, [#allocation5]  }
 0x2a1   :  { %364 = dma.done.wait [#allocation3], 128  }
 0x2a2   :  { %365 = vsyncadd [#allocation3], 4294967168 }
 0x2a3   :  { %366 = dma.done.wait [#allocation5], 128  }
 0x2a4   :  { %367 = vsyncadd [#allocation5], 4294967168 }
 0x2a5   :  { %277 = vsyncpa [#allocation3], 1 }
 0x2a6   :  { %278 = vsyncpa [#allocation5], 1 }

</bundles_post_ra>
